<compile_context>
chip_gen: v7x
topology: tpu7x:2x2x1
jax: 0.10.0
libtpu: 0.0.40
codegen_flags: <defaults>
</compile_context>

<pallas_src>
import functools

import jax
import jax.numpy as jnp
from jax.experimental import pallas as pl
from jax.experimental.pallas import tpu as pltpu


def _round_up(x, m):
    return (x + m - 1) // m * m


def _vmem_limit_bytes():
    """Per-generation VMEM limit with headroom below the physical size."""
    try:
        phys = int(pltpu.get_tpu_info().vmem_capacity_bytes)
    except Exception:
        phys = 64 * 1024 * 1024  # conservative (v7x per-TC size)
    # ~85% of physical, capped at 112 MiB (v5e/v6e have 128 MiB, v7x 64 MiB).
    return min(int(phys * 0.85), 112 * 1024 * 1024)


def _choose_batch_tile(B, H, n_pad, n_sub_pad, vmem_limit, block_b=None):
    """Pick the batch tile from the VMEM budget (rows, multiple of 128)."""
    if block_b is None:
        resident = 2 * (H * n_pad * 2 + n_pad * 4)          # fused weight + bias
        per_row = (2 * H * 4                                 # hidden dbuf (<=f32)
                   + 2 * n_sub_pad * 4                       # compact out dbuf (f32)
                   + 6 * n_pad * 4)                          # in-kernel f32 temps
        budget = int(vmem_limit * 0.7) - resident
        tb = budget // per_row if budget > per_row else 128
        tb = max(128, min(4096, tb))
    else:
        tb = max(128, int(block_b))
    tb = tb // 128 * 128
    b128 = _round_up(B, 128)
    tb = min(tb, b128)
    # keep >=2 (ideally >=4) grid steps when the batch allows (v7x: 2 TCs).
    if b128 >= 4 * 128:
        tb = min(tb, max(128, (b128 // 4) // 128 * 128))
    elif b128 >= 2 * 128:
        tb = min(tb, max(128, (b128 // 2) // 128 * 128))
    return max(128, tb)


def _mdn_fused_kernel(h_ref, w_ref, b_ref, out_ref, *, k, cov_reg, transposed_out):
    """One batch tile: fused (pi|sigma|mu) linear + per-head epilogue.

    h_ref  : (TB, H)          input dtype (cast to bf16 for the MXU)
    w_ref  : (H, Npad)  bf16  columns: [pi(K) | sigma(2K) | mu(2K) | zero pad]
    b_ref  : (1, Npad)  f32
    out_ref: (Nsub, TB) f32 compact transposed store   (transposed_out=True)
             (TB, Npad) f32 lane-dense store           (transposed_out=False)
    """
    h = h_ref[...].astype(jnp.bfloat16)
    w = w_ref[...]
    # Single MXU pass for all three heads, f32 accumulation.
    z = jnp.dot(h, w, preferred_element_type=jnp.float32) + b_ref[...]

    col = jax.lax.broadcasted_iota(jnp.int32, z.shape, dimension=1)
    is_pi = col < k
    is_sigma = (col >= k) & (col < 3 * k)

    # Masked, numerically stable softmax max over the K pi columns.
    pi_logits = jnp.where(is_pi, z, -jnp.inf)
    m = jnp.max(pi_logits, axis=-1, keepdims=True)

    # Single exp for both heads: pi columns shifted by m, sigma columns raw,
    # mu/pad columns exp(0)=1 (no overflow, result discarded by the selects).
    z_shift = jnp.where(is_pi, z - m, jnp.where(is_sigma, z, 0.0))
    e = jnp.exp(z_shift)

    num = jnp.where(is_pi, e, 0.0)
    denom = jnp.sum(num, axis=-1, keepdims=True)
    pi_vals = num / denom                      # exact: rows sum to 1
    sigma_vals = e + cov_reg                   # exp(.) + covariance_reg

    res = jnp.where(is_pi, pi_vals, jnp.where(is_sigma, sigma_vals, z))

    if transposed_out:
        # Compact store: only ceil(5K/8)*8 sublanes of the transposed result
        # hit HBM (vs 128 padded f32 lanes per row).
        res_t = jnp.transpose(res)             # (Npad, TB)
        out_ref[...] = res_t[: out_ref.shape[0], :]
    else:
        out_ref[...] = res


def _run_pallas(h_pad, w_fused, b_fused, *, tb, n_pad, n_sub_pad, k, cov_reg,
                vmem_limit, transposed_out):
    b_rows, H = h_pad.shape
    grid = (b_rows // tb,)

    if transposed_out:
        out_shape = jax.ShapeDtypeStruct((n_sub_pad, b_rows), jnp.float32)
        out_spec = pl.BlockSpec((n_sub_pad, tb), lambda i: (0, i))
        out_bytes = 4 * n_sub_pad * b_rows
    else:
        out_shape = jax.ShapeDtypeStruct((b_rows, n_pad), jnp.float32)
        out_spec = pl.BlockSpec((tb, n_pad), lambda i: (i, 0))
        out_bytes = 4 * b_rows * n_pad

    kernel = functools.partial(_mdn_fused_kernel, k=k, cov_reg=cov_reg,
                               transposed_out=transposed_out)
    cost = pl.CostEstimate(
        flops=2 * b_rows * H * n_pad,
        transcendentals=b_rows * n_pad,
        bytes_accessed=(jnp.dtype(h_pad.dtype).itemsize * b_rows * H
                        + 2 * H * n_pad + 4 * n_pad + out_bytes),
    )

    return pl.pallas_call(
        kernel,
        grid=grid,
        in_specs=[
            pl.BlockSpec((tb, H), lambda i: (i, 0)),     # hidden: tiled over batch
            pl.BlockSpec((H, n_pad), lambda i: (0, 0)),  # fused weight: resident
            pl.BlockSpec((1, n_pad), lambda i: (0, 0)),  # fused bias: resident
        ],
        out_specs=out_spec,
        out_shape=out_shape,
        compiler_params=pltpu.CompilerParams(
            dimension_semantics=("parallel",),
            vmem_limit_bytes=int(vmem_limit),
        ),
        cost_estimate=cost,
    )(h_pad, w_fused, b_fused)


def prepare_mdn_decoder(params, n_components, n_output=2):
    """Hoisted, one-time weight fusion: concat + pad + bf16 cast of the heads."""
    K = n_components
    n_total = K + 2 * K * n_output                    # K + 2K + 2K = 5K
    n_pad = _round_up(max(n_total, 128), 128)         # lane-dense matmul width
    n_sub_pad = _round_up(n_total, 8)                 # compact transposed store rows

    w = jnp.concatenate([params["w_pi"], params["w_sigma"], params["w_mu"]], axis=1)
    b = jnp.concatenate([params["b_pi"], params["b_sigma"], params["b_mu"]], axis=0)
    w = jnp.pad(w, ((0, 0), (0, n_pad - n_total))).astype(jnp.bfloat16)
    b = jnp.pad(b, (0, n_pad - n_total)).astype(jnp.float32).reshape(1, n_pad)

    return {
        "w_fused": w, "b_fused": b,
        "n_components": K, "n_output": n_output,
        "n_total": n_total, "n_pad": n_pad, "n_sub_pad": n_sub_pad,
        "n_hidden": params["w_pi"].shape[0],
    }


def mdn_decoder_forward(hidden, prepared, *, covariance_reg=1e-6, block_b=None):
    """Pallas implementation of MDNDecoder.forward (covariance_type='diagonal').

    hidden: (B, n_hidden) float32 (bf16 also accepted)
    prepared: output of prepare_mdn_decoder(params, n_components)
    returns [pi (B,K), sigma (B,K,2), mu (B,K,2)]
    """
    B, H = hidden.shape
    assert H == prepared["n_hidden"]
    K = prepared["n_components"]
    n_out = prepared["n_output"]
    n_pad = prepared["n_pad"]
    n_sub = prepared["n_sub_pad"]
    n_total = prepared["n_total"]

    vmem_limit = _vmem_limit_bytes()
    tb = _choose_batch_tile(B, H, n_pad, n_sub, vmem_limit, block_b)
    b_rows = _round_up(B, tb)
    h_in = hidden if b_rows == B else jnp.pad(hidden, ((0, b_rows - B), (0, 0)))

    common = dict(tb=tb, n_pad=n_pad, n_sub_pad=n_sub, k=K,
                  cov_reg=float(covariance_reg), vmem_limit=vmem_limit)

    try:
        out = _run_pallas(h_in, prepared["w_fused"], prepared["b_fused"],
                          transposed_out=True, **common)
        jax.block_until_ready(out)                 # surface any lowering error here
        outc = out[:, :B]                          # (n_sub, B) compact slab
        pi = outc[:K, :].T
        sigma = outc[K:K + K * n_out, :].T.reshape(B, K, n_out)
        mu = outc[K + K * n_out:n_total, :].T.reshape(B, K, n_out)
    except Exception:
        # Fallback: lane-dense f32 output layout (known-good, more writeback).
        out = _run_pallas(h_in, prepared["w_fused"], prepared["b_fused"],
                          transposed_out=False, **common)
        outc = out[:B]
        pi = outc[:, :K]
        sigma = outc[:, K:K + K * n_out].reshape(B, K, n_out)
        mu = outc[:, K + K * n_out:n_total].reshape(B, K, n_out)
    return [pi, sigma, mu]


def init_mdn_params(key, n_hidden, n_components, n_output=2):
    """Deterministic init matching nn.init.normal_(std=0.001), bias=0.
    Weights are stored transposed: (n_hidden, n_out)."""
    k1, k2, k3 = jax.random.split(key, 3)
    std = 0.001
    return {
        "w_pi": std * jax.random.normal(k1, (n_hidden, n_components), jnp.float32),
        "b_pi": jnp.zeros((n_components,), jnp.float32),
        "w_sigma": std * jax.random.normal(
            k2, (n_hidden, n_components * n_output), jnp.float32),
        "b_sigma": jnp.zeros((n_components * n_output,), jnp.float32),
        "w_mu": std * jax.random.normal(
            k3, (n_hidden, n_components * n_output), jnp.float32),
        "b_mu": jnp.zeros((n_components * n_output,), jnp.float32),
    }


def _reference_forward(hidden, params, n_components, covariance_reg=1e-6):
    """Pure-JAX f32 reference mirroring the PyTorch forward (diagonal)."""
    B = hidden.shape[0]
    logits = hidden @ params["w_pi"] + params["b_pi"]
    pi = jax.nn.softmax(logits, axis=1)
    sigma = jnp.exp(hidden @ params["w_sigma"] + params["b_sigma"]) + covariance_reg
    sigma = sigma.reshape(B, n_components, -1)
    mu = (hidden @ params["w_mu"] + params["b_mu"]).reshape(B, n_components, -1)
    return [pi, sigma, mu]


# TODO(synk): covariance_type='general' branch (exp/identity/exp column stacking
# with sqrt(covariance_reg)) is not implemented; only the default 'diagonal'
# path is covered.

if __name__ == "__main__":
    n_hidden = 32
    n_components = 4
    batch_size = 8

    key = jax.random.PRNGKey(0)
    k_param, k_hidden = jax.random.split(key)

    params = init_mdn_params(k_param, n_hidden, n_components)
    hidden = jax.random.normal(k_hidden, (batch_size, n_hidden), jnp.float32)

    prepared = prepare_mdn_decoder(params, n_components)   # one-time weight fusion
    pi, sigma, mu = mdn_decoder_forward(hidden, prepared, covariance_reg=1e-6)
    jax.block_until_ready((pi, sigma, mu))

    # sanity check against the pure-JAX f32 reference (tolerance accounts for
    # the bf16 matmul operands).
    pi_r, sigma_r, mu_r = _reference_forward(hidden, params, n_components)
    assert pi.shape == (batch_size, n_components)
    assert sigma.shape == (batch_size, n_components, 2)
    assert mu.shape == (batch_size, n_components, 2)
    assert jnp.allclose(pi, pi_r, atol=2e-3)
    assert jnp.allclose(sigma, sigma_r, atol=2e-3)
    assert jnp.allclose(mu, mu_r, atol=2e-3)

    print("KERNEL_OK")
</pallas_src>

<mosaic_0001>
module attributes {stable_mosaic.version = 11 : i64} {
  func.func @_mdn_fused_kernel(%arg0: i32, %arg1: memref<128x32xf32, #tpu.memory_space<vmem>>, %arg2: memref<32x128xbf16, #tpu.memory_space<vmem>>, %arg3: memref<1x128xf32, #tpu.memory_space<vmem>>, %arg4: memref<24x128xf32, #tpu.memory_space<vmem>>) attributes {dimension_semantics = [#tpu.dimension_semantics<parallel>], iteration_bounds = array<i64: 1>, scalar_prefetch = 0 : i64, scratch_operands = 0 : i64, tpu.core_type = #tpu.core_type<tc>, window_params = [{transform_indices = @transform_0, window_bounds = array<i64: 128, 32>}, {pipeline_mode = #tpu.pipeline_mode<synchronous>, transform_indices = @transform_1, window_bounds = array<i64: 32, 128>}, {pipeline_mode = #tpu.pipeline_mode<synchronous>, transform_indices = @transform_2, window_bounds = array<i64: 1, 128>}, {transform_indices = @transform_3, window_bounds = array<i64: 24, 128>}]} {
    %c0 = arith.constant 0 : index
    %c0_0 = arith.constant 0 : index
    %0 = vector.load %arg1[%c0, %c0_0] : memref<128x32xf32, #tpu.memory_space<vmem>>, vector<128x32xf32>
    %1 = arith.truncf %0 : vector<128x32xf32> to vector<128x32xbf16>
    %c0_1 = arith.constant 0 : index
    %c0_2 = arith.constant 0 : index
    %2 = vector.load %arg2[%c0_1, %c0_2] : memref<32x128xbf16, #tpu.memory_space<vmem>>, vector<32x128xbf16>
    %cst = arith.constant dense<0.000000e+00> : vector<128x128xf32>
    %3 = tpu.matmul %1, %2, %cst {dimension_numbers = #tpu.dot_dimension_numbers<[1], [0], [0], [1], [0, 0, 1, 1], [], []>} : vector<128x32xbf16>, vector<32x128xbf16>, vector<128x128xf32> -> vector<128x128xf32>
    %c0_3 = arith.constant 0 : index
    %c0_4 = arith.constant 0 : index
    %4 = vector.load %arg3[%c0_3, %c0_4] : memref<1x128xf32, #tpu.memory_space<vmem>>, vector<1x128xf32>
    %5 = vector.broadcast %4 : vector<1x128xf32> to vector<128x128xf32>
    %6 = arith.addf %3, %5 : vector<128x128xf32>
    %7 = tpu.iota {dimensions = array<i32: 1>} : vector<128x128xi32>
    %c4_i32 = arith.constant 4 : i32
    %8 = vector.broadcast %c4_i32 : i32 to vector<128x128xi32>
    %9 = arith.cmpi slt, %7, %8 : vector<128x128xi32>
    %c4_i32_5 = arith.constant 4 : i32
    %10 = vector.broadcast %c4_i32_5 : i32 to vector<128x128xi32>
    %11 = arith.cmpi sge, %7, %10 : vector<128x128xi32>
    %c12_i32 = arith.constant 12 : i32
    %12 = vector.broadcast %c12_i32 : i32 to vector<128x128xi32>
    %13 = arith.cmpi slt, %7, %12 : vector<128x128xi32>
    %14 = arith.andi %11, %13 : vector<128x128xi1>
    %cst_6 = arith.constant 0xFF800000 : f32
    %15 = vector.broadcast %cst_6 : f32 to vector<128x128xf32>
    %16 = arith.select %9, %6, %15 : vector<128x128xi1>, vector<128x128xf32>
    %cst_7 = arith.constant dense<0xFF800000> : vector<128xf32>
    %17 = vector.multi_reduction <maximumf>, %16, %cst_7 [1] : vector<128x128xf32> to vector<128xf32>
    %18 = vector.shape_cast %17 : vector<128xf32> to vector<128x1xf32>
    %19 = vector.broadcast %18 : vector<128x1xf32> to vector<128x128xf32>
    %20 = arith.subf %6, %19 : vector<128x128xf32>
    %cst_8 = arith.constant 0.000000e+00 : f32
    %21 = vector.broadcast %cst_8 : f32 to vector<128x128xf32>
    %22 = arith.select %14, %6, %21 : vector<128x128xi1>, vector<128x128xf32>
    %23 = arith.select %9, %20, %22 : vector<128x128xi1>, vector<128x128xf32>
    %24 = math.exp %23 : vector<128x128xf32>
    %cst_9 = arith.constant 0.000000e+00 : f32
    %25 = vector.broadcast %cst_9 : f32 to vector<128x128xf32>
    %26 = arith.select %9, %24, %25 : vector<128x128xi1>, vector<128x128xf32>
    %cst_10 = arith.constant dense<0.000000e+00> : vector<128xf32>
    %27 = vector.multi_reduction <add>, %26, %cst_10 [1] : vector<128x128xf32> to vector<128xf32>
    %28 = vector.shape_cast %27 : vector<128xf32> to vector<128x1xf32>
    %29 = vector.broadcast %28 : vector<128x1xf32> to vector<128x128xf32>
    %30 = arith.divf %26, %29 : vector<128x128xf32>
    %cst_11 = arith.constant 9.99999997E-7 : f32
    %31 = vector.broadcast %cst_11 : f32 to vector<128x128xf32>
    %32 = arith.addf %24, %31 : vector<128x128xf32>
    %33 = arith.select %14, %32, %6 : vector<128x128xi1>, vector<128x128xf32>
    %34 = arith.select %9, %30, %33 : vector<128x128xi1>, vector<128x128xf32>
    %35 = tpu.transpose %34, [1, 0] : vector<128x128xf32> -> vector<128x128xf32>
    %36 = vector.extract_strided_slice %35 {offsets = [0, 0], sizes = [24, 128], strides = [1, 1]} : vector<128x128xf32> to vector<24x128xf32>
    %c0_12 = arith.constant 0 : index
    %c0_13 = arith.constant 0 : index
    %37 = vector.load %arg4[%c0_12, %c0_13] : memref<24x128xf32, #tpu.memory_space<vmem>>, vector<24x128xf32>
    tpu.vector_store %arg4[%c0_12, %c0_13], %36 {strides = array<i32>} : memref<24x128xf32, #tpu.memory_space<vmem>>, vector<24x128xf32>,
    return
  }
  func.func @transform_0(%arg0: i32) -> (i32, i32) {
    %c0_i32 = arith.constant 0 : i32
    %c0_i32_0 = arith.constant 0 : i32
    return %arg0, %c0_i32 : i32, i32
  }
  func.func @transform_1(%arg0: i32) -> (i32, i32) {
    %c0_i32 = arith.constant 0 : i32
    %c0_i32_0 = arith.constant 0 : i32
    %c0_i32_1 = arith.constant 0 : i32
    return %c0_i32, %c0_i32_0 : i32, i32
  }
  func.func @transform_2(%arg0: i32) -> (i32, i32) {
    %c0_i32 = arith.constant 0 : i32
    %c0_i32_0 = arith.constant 0 : i32
    %c0_i32_1 = arith.constant 0 : i32
    return %c0_i32, %c0_i32_0 : i32, i32
  }
  func.func @transform_3(%arg0: i32) -> (i32, i32) {
    %c0_i32 = arith.constant 0 : i32
    %c0_i32_0 = arith.constant 0 : i32
    return %c0_i32, %arg0 : i32, i32
  }
}

module attributes {stable_mosaic.version = 11 : i64} {
  func.func @_mdn_fused_kernel(%arg0: i32, %arg1: memref<128x32xf32, #tpu.memory_space<vmem>>, %arg2: memref<32x128xbf16, #tpu.memory_space<vmem>>, %arg3: memref<1x128xf32, #tpu.memory_space<vmem>>, %arg4: memref<128x128xf32, #tpu.memory_space<vmem>>) attributes {dimension_semantics = [#tpu.dimension_semantics<parallel>], iteration_bounds = array<i64: 1>, scalar_prefetch = 0 : i64, scratch_operands = 0 : i64, tpu.core_type = #tpu.core_type<tc>, window_params = [{transform_indices = @transform_0, window_bounds = array<i64: 128, 32>}, {pipeline_mode = #tpu.pipeline_mode<synchronous>, transform_indices = @transform_1, window_bounds = array<i64: 32, 128>}, {pipeline_mode = #tpu.pipeline_mode<synchronous>, transform_indices = @transform_2, window_bounds = array<i64: 1, 128>}, {transform_indices = @transform_3, window_bounds = array<i64: 128, 128>}]} {
    %c0 = arith.constant 0 : index
    %c0_0 = arith.constant 0 : index
    %0 = vector.load %arg1[%c0, %c0_0] : memref<128x32xf32, #tpu.memory_space<vmem>>, vector<128x32xf32>
    %1 = arith.truncf %0 : vector<128x32xf32> to vector<128x32xbf16>
    %c0_1 = arith.constant 0 : index
    %c0_2 = arith.constant 0 : index
    %2 = vector.load %arg2[%c0_1, %c0_2] : memref<32x128xbf16, #tpu.memory_space<vmem>>, vector<32x128xbf16>
    %cst = arith.constant dense<0.000000e+00> : vector<128x128xf32>
    %3 = tpu.matmul %1, %2, %cst {dimension_numbers = #tpu.dot_dimension_numbers<[1], [0], [0], [1], [0, 0, 1, 1], [], []>} : vector<128x32xbf16>, vector<32x128xbf16>, vector<128x128xf32> -> vector<128x128xf32>
    %c0_3 = arith.constant 0 : index
    %c0_4 = arith.constant 0 : index
    %4 = vector.load %arg3[%c0_3, %c0_4] : memref<1x128xf32, #tpu.memory_space<vmem>>, vector<1x128xf32>
    %5 = vector.broadcast %4 : vector<1x128xf32> to vector<128x128xf32>
    %6 = arith.addf %3, %5 : vector<128x128xf32>
    %7 = tpu.iota {dimensions = array<i32: 1>} : vector<128x128xi32>
    %c4_i32 = arith.constant 4 : i32
    %8 = vector.broadcast %c4_i32 : i32 to vector<128x128xi32>
    %9 = arith.cmpi slt, %7, %8 : vector<128x128xi32>
    %c4_i32_5 = arith.constant 4 : i32
    %10 = vector.broadcast %c4_i32_5 : i32 to vector<128x128xi32>
    %11 = arith.cmpi sge, %7, %10 : vector<128x128xi32>
    %c12_i32 = arith.constant 12 : i32
    %12 = vector.broadcast %c12_i32 : i32 to vector<128x128xi32>
    %13 = arith.cmpi slt, %7, %12 : vector<128x128xi32>
    %14 = arith.andi %11, %13 : vector<128x128xi1>
    %cst_6 = arith.constant 0xFF800000 : f32
    %15 = vector.broadcast %cst_6 : f32 to vector<128x128xf32>
    %16 = arith.select %9, %6, %15 : vector<128x128xi1>, vector<128x128xf32>
    %cst_7 = arith.constant dense<0xFF800000> : vector<128xf32>
    %17 = vector.multi_reduction <maximumf>, %16, %cst_7 [1] : vector<128x128xf32> to vector<128xf32>
    %18 = vector.shape_cast %17 : vector<128xf32> to vector<128x1xf32>
    %19 = vector.broadcast %18 : vector<128x1xf32> to vector<128x128xf32>
    %20 = arith.subf %6, %19 : vector<128x128xf32>
    %cst_8 = arith.constant 0.000000e+00 : f32
    %21 = vector.broadcast %cst_8 : f32 to vector<128x128xf32>
    %22 = arith.select %14, %6, %21 : vector<128x128xi1>, vector<128x128xf32>
    %23 = arith.select %9, %20, %22 : vector<128x128xi1>, vector<128x128xf32>
    %24 = math.exp %23 : vector<128x128xf32>
    %cst_9 = arith.constant 0.000000e+00 : f32
    %25 = vector.broadcast %cst_9 : f32 to vector<128x128xf32>
    %26 = arith.select %9, %24, %25 : vector<128x128xi1>, vector<128x128xf32>
    %cst_10 = arith.constant dense<0.000000e+00> : vector<128xf32>
    %27 = vector.multi_reduction <add>, %26, %cst_10 [1] : vector<128x128xf32> to vector<128xf32>
    %28 = vector.shape_cast %27 : vector<128xf32> to vector<128x1xf32>
    %29 = vector.broadcast %28 : vector<128x1xf32> to vector<128x128xf32>
    %30 = arith.divf %26, %29 : vector<128x128xf32>
    %cst_11 = arith.constant 9.99999997E-7 : f32
    %31 = vector.broadcast %cst_11 : f32 to vector<128x128xf32>
    %32 = arith.addf %24, %31 : vector<128x128xf32>
    %33 = arith.select %14, %32, %6 : vector<128x128xi1>, vector<128x128xf32>
    %34 = arith.select %9, %30, %33 : vector<128x128xi1>, vector<128x128xf32>
    %c0_12 = arith.constant 0 : index
    %c0_13 = arith.constant 0 : index
    %35 = vector.load %arg4[%c0_12, %c0_13] : memref<128x128xf32, #tpu.memory_space<vmem>>, vector<128x128xf32>
    tpu.vector_store %arg4[%c0_12, %c0_13], %34 {strides = array<i32>} : memref<128x128xf32, #tpu.memory_space<vmem>>, vector<128x128xf32>,
    return
  }
  func.func @transform_0(%arg0: i32) -> (i32, i32) {
    %c0_i32 = arith.constant 0 : i32
    %c0_i32_0 = arith.constant 0 : i32
    return %arg0, %c0_i32 : i32, i32
  }
  func.func @transform_1(%arg0: i32) -> (i32, i32) {
    %c0_i32 = arith.constant 0 : i32
    %c0_i32_0 = arith.constant 0 : i32
    %c0_i32_1 = arith.constant 0 : i32
    return %c0_i32, %c0_i32_0 : i32, i32
  }
  func.func @transform_2(%arg0: i32) -> (i32, i32) {
    %c0_i32 = arith.constant 0 : i32
    %c0_i32_0 = arith.constant 0 : i32
    %c0_i32_1 = arith.constant 0 : i32
    return %c0_i32, %c0_i32_0 : i32, i32
  }
  func.func @transform_3(%arg0: i32) -> (i32, i32) {
    %c0_i32 = arith.constant 0 : i32
    %c0_i32_0 = arith.constant 0 : i32
    return %arg0, %c0_i32 : i32, i32
  }
}

</mosaic_0001>

<bundles_post_ra>
// kernel: tpu_custom_call.1
= control target key start
LH: loop header
LB: loop body
LE: loop exit
PB: predicated region body
PF: predicated region fallthrough
CT: control target
= control target key end

     0   :  { %vm63_vm0 = vcmask 261120   ;;  %s1161_s0 = inlined_call_operand.vmem [shape: f32[128,32], index: 0, kind: input, shape index: {}]   ;;  %s1162_s1 = inlined_call_operand.vmem [shape: bf16[32,128], index: 1, kind: input, shape index: {}]   ;;  %s1163_s2 = inlined_call_operand.vmem [shape: f32[1,128], index: 2, kind: input, shape index: {}]   ;;  %s1164_s3 = inlined_call_operand.hbm [shape: f32[24,128], index: 3, kind: output, shape index: {}]  }
   0x1   :  { %v546_v0 = vld [vmem:[%s1162_s1] sm:$0xff]   ;;  %v547_v1 = vld [vmem:[%s1162_s1 + $0x8] sm:$0xff]   ;;  %v18_v5 = vld [vmem:[%s1161_s0 + $0x10] sm:$0xff] }
   0x2   :  { %519 = vmatprep.subr.bf16.mxu0 %v546_v0  ;;  %v16_v2 = vld [vmem:[%s1161_s0] sm:$0xff]  ;;  %v17_v3 = vld [vmem:[%s1161_s0 + $0x8] sm:$0xff]  ;;  %539 = vmatprep.subr.bf16.mxu1 %v546_v0  ;;  %v19_v6 = vld [vmem:[%s1161_s0 + $0x18] sm:$0xff] }
   0x3   :  { %520 = vmatpush3.bf16.msra.mxu0 %v546_v0  ;;  %v32_v4 = vpack.c.bf16 %v17_v3, %v16_v2  ;;  %541 = vmatpush3.bf16.msra.mxu1 %v546_v0  ;;  %v20_v7 = vld [vmem:[%s1161_s0 + $0x20] sm:$0xff]  ;;  %v21_v8 = vld [vmem:[%s1161_s0 + $0x28] sm:$0xff]  ;;  %v26_v11 = vld [vmem:[%s1161_s0 + $0x50] sm:$0xff]  ;;  %v33_v13 = vpack.c.bf16 %v19_v6, %v18_v5 }
   0x4   :  { %521 = vmatprep.subr.bf16.mxu0 %v547_v1  ;;  %540 = vmatprep.subr.bf16.mxu1 %v547_v1  ;;  %v24_v9 = vld [vmem:[%s1161_s0 + $0x40] sm:$0xff]  ;;  %v25_v10 = vld [vmem:[%s1161_s0 + $0x48] sm:$0xff]  ;;  %v27_v12 = vld [vmem:[%s1161_s0 + $0x58] sm:$0xff]  ;;  %v34_v18 = vpack.c.bf16 %v21_v8, %v20_v7 }
   0x5   :  { %523 = vmatprep.mubr.msk.bf16.mxu0 %vm63_vm0, %v32_v4  ;;  %v36_v14 = vpack.c.bf16 %v25_v10, %v24_v9  ;;  %v37_v15 = vpack.c.bf16 %v27_v12, %v26_v11  ;;  %v28_v16 = vld [vmem:[%s1161_s0 + $0x60] sm:$0xff]  ;;  %v29_v17 = vld [vmem:[%s1161_s0 + $0x68] sm:$0xff] }
   0x6   :  { %v38_v19 = vpack.c.bf16 %v29_v17, %v28_v16 }
   0x7   :  { %522 = vmatpush3.bf16.msra.mxu0 %v547_v1  ;;  %542 = vmatpush3.bf16.msra.mxu1 %v547_v1 }
   0x8   :  { %8 = vsyncpa [#allocation3], 0  ;;  %531 = vmatprep.mubr.msk.bf16.mxu1 %vm63_vm0, %v36_v14  ;;  %v22_v20 = vld [vmem:[%s1161_s0 + $0x30] sm:$0xff]  ;;  %v23_v21 = vld [vmem:[%s1161_s0 + $0x38] sm:$0xff]  ;;  %v185_v26 = vlaneseq }
   0x9   :  { %v30_v22 = vld [vmem:[%s1161_s0 + $0x70] sm:$0xff]  ;;  %v31_v23 = vld [vmem:[%s1161_s0 + $0x78] sm:$0xff]  ;;  %v35_v24 = vpack.c.bf16 %v23_v21, %v22_v20  ;;  %v498_v28 = vld [vmem:[%s1163_s2] ss:$0 sm:$0xff]  ;;  %s636_s0 = smov [#allocation2]  }
   0xa   :  { %524 = vmatmul.mubr.msk.bf16.vlgmr.msra.gmra.mrb[0].mxu0 %vm63_vm0, %v33_v13  ;;  %532 = vmatmul.mubr.msk.bf16.vlgmr.msra.gmra.mrb[0].mxu1 %vm63_vm0, %v37_v15  ;;  %v39_v25 = vpack.c.bf16 %v31_v23, %v30_v22  ;;  %v721_v27 = vand.u32 127, %v185_v26  ;;  %s487_s2 = sshll.u32 %s636_s0, 4  ;;  %s488_s2 = int_to_ptr.vmem [resolvable:$true] %s487_s2 }
   0xb   :  { %527 = vmatprep.mubr.msk.bf16.mxu0 %vm63_vm0, %v34_v18  ;;  %535 = vmatprep.mubr.msk.bf16.mxu1 %vm63_vm0, %v38_v19  ;;  %s612_s22 = scalar_lea.vmem %s488_s2, 384  ;;  %p617_p1 = scmp.lt.s32.totalorder %s488_s2, %s488_s2 }
   0xc   :  { %vm187_vm1 = vcmp.lt.s32.totalorder %v721_v27, 4  ;;  %vm188_vm2 = vcmp.ge.s32.totalorder %v721_v27, 4  ;;  %vm189_vm3 = vcmp.lt.s32.totalorder %v721_v27, 12  ;;  %p613_p0 = scmp.ne.s32.totalorder %s488_s2, %s612_s22  ;;  %p618_p2 = scmp.lt.s32.totalorder %s612_s22, %s612_s22 }
   0xd   :  { %vm809_vm4 = vmand %vm188_vm2, %vm189_vm3 }
   0xe   :  { %p619_p3 = por %p618_p2, %p617_p1 }
  0x10   :  { %p620_p4 = pnand %p619_p3, %p613_p0 }
  0x12   :  { %528 = vmatmul.mubr.msk.bf16.gmra.mrb[4].mxu0 %vm63_vm0, %v35_v24  ;;  %536 = vmatmul.mubr.msk.bf16.gmra.mrb[4].mxu1 %vm63_vm0, %v39_v25 }
  0xdd   :  { %v525_v29 = vpop.f32.mrb[0].mxu0  ;;  %v533_v30 = vpop.f32.mrb[0].mxu1 }
  0xde   :  { %v727_v31 = vadd.f32 %v525_v29, %v498_v28  ;;  %v122_v32 = vpop.f32.mrb[1].mxu0  ;;  %v154_v33 = vpop.f32.mrb[1].mxu1  ;;  %v768_v62 = vadd.f32 %v533_v30, %v498_v28 }
  0xdf   :  { %v729_v34 = vadd.f32 %v498_v28, %v122_v32  ;;  %v526_v35 = vpop.f32.mrb[2].mxu0  ;;  %v534_v36 = vpop.f32.mrb[2].mxu1  ;;  %v761_v59 = vadd.f32 %v498_v28, %v154_v33 }
  0xe0   :  { %v731_v37 = vadd.f32 %v526_v35, %v498_v28  ;;  %v125_v38 = vpop.f32.mrb[3].mxu0  ;;  %v193_v39 = vsel %vm187_vm1, %v727_v31, -inf  ;;  %v157_v40 = vpop.f32.mrb[3].mxu1  ;;  %v776_v1 = vadd.f32 %v534_v36, %v498_v28  ;;  %v201_v4 = vsel %vm187_vm1, %v768_v62, -inf }
  0xe1   :  { %v736_v41 = vadd.f32 %v498_v28, %v125_v38  ;;  %211 = vmax.xlane.f32.xlu1 %v193_v39  ;;  %v191_v42 = vsel %vm187_vm1, %v729_v34, -inf  ;;  %v766_v61 = vadd.f32 %v498_v28, %v157_v40  ;;  %v199_v0 = vsel %vm187_vm1, %v761_v59, -inf }
  0xe2   :  { %207 = vmax.xlane.f32.xlu0 %v191_v42  ;;  %v194_v43 = vsel %vm187_vm1, %v731_v37, -inf  ;;  %v202_v6 = vsel %vm187_vm1, %v776_v1, -inf  ;;  %v257_v17 = vsel %vm809_vm4, %v727_v31, 0.0  ;;  %v255_v20 = vsel %vm809_vm4, %v729_v34, 0.0 }
  0xe3   :  { %v192_v45 = vsel %vm187_vm1, %v736_v41, -inf  ;;  %v200_v2 = vsel %vm187_vm1, %v766_v61, -inf  ;;  %v256_v32 = vsel %vm809_vm4, %v736_v41, 0.0 }
  0xe5   :  { %213 = vmax.xlane.f32.xlu1 %v194_v43  ;;  %v529_v44 = vpop.f32.mrb[4].mxu0  ;;  %v537_v46 = vpop.f32.mrb[4].mxu1 }
  0xe6   :  { %v138_v47 = vpop.f32.mrb[5].mxu0  ;;  %209 = vmax.xlane.f32.xlu0 %v192_v45  ;;  %v170_v48 = vpop.f32.mrb[5].mxu1  ;;  %v749_v54 = vadd.f32 %v529_v44, %v498_v28  ;;  %v791_v7 = vadd.f32 %v537_v46, %v498_v28 }
  0xe7   :  { %v747_v49 = vadd.f32 %v498_v28, %v138_v47  ;;  %v530_v50 = vpop.f32.mrb[6].mxu0  ;;  %v538_v51 = vpop.f32.mrb[6].mxu1  ;;  %v781_v3 = vadd.f32 %v498_v28, %v170_v48 }
  0xe8   :  { %v141_v52 = vpop.f32.mrb[7].mxu0  ;;  %v173_v53 = vpop.f32.mrb[7].mxu1  ;;  %v756_v57 = vadd.f32 %v530_v50, %v498_v28  ;;  %v197_v60 = vsel %vm187_vm1, %v749_v54, -inf  ;;  %v796_v9 = vadd.f32 %v538_v51, %v498_v28  ;;  %v205_v11 = vsel %vm187_vm1, %v791_v7, -inf }
  0xe9   :  { %v751_v55 = vadd.f32 %v498_v28, %v141_v52  ;;  %v195_v56 = vsel %vm187_vm1, %v747_v49, -inf  ;;  %v786_v5 = vadd.f32 %v498_v28, %v173_v53  ;;  %v203_v8 = vsel %vm187_vm1, %v781_v3, -inf }
  0xea   :  { %215 = vmax.xlane.f32.xlu0 %v195_v56  ;;  %v198_v63 = vsel %vm187_vm1, %v756_v57, -inf  ;;  %v206_v12 = vsel %vm187_vm1, %v796_v9, -inf  ;;  %v258_v28 = vsel %vm809_vm4, %v731_v37, 0.0  ;;  %v259_v42 = vsel %vm809_vm4, %v747_v49, 0.0 }
  0xeb   :  { %v196_v58 = vsel %vm187_vm1, %v751_v55, -inf  ;;  %v204_v10 = vsel %vm187_vm1, %v786_v5, -inf  ;;  %v260_v45 = vsel %vm809_vm4, %v751_v55, 0.0  ;;  %v261_v51 = vsel %vm809_vm4, %v749_v54, 0.0 }
  0xec   :  { %217 = vmax.xlane.f32.xlu1 %v196_v58 }
  0xee   :  { %219 = vmax.xlane.f32.xlu0 %v197_v60 }
  0xf0   :  { %221 = vmax.xlane.f32.xlu1 %v198_v63 }
  0xf2   :  { %223 = vmax.xlane.f32.xlu0 %v199_v0  ;;  %v262_v0 = vsel %vm809_vm4, %v756_v57, 0.0 }
  0xf4   :  { %225 = vmax.xlane.f32.xlu1 %v200_v2 }
  0xf6   :  { %227 = vmax.xlane.f32.xlu0 %v201_v4 }
  0xf8   :  { %229 = vmax.xlane.f32.xlu1 %v202_v6 }
  0xfa   :  { %231 = vmax.xlane.f32.xlu0 %v203_v8 }
  0xfc   :  { %233 = vmax.xlane.f32.xlu1 %v204_v10 }
  0xfe   :  { %235 = vmax.xlane.f32.xlu0 %v205_v11 }
 0x100   :  { %237 = vmax.xlane.f32.xlu1 %v206_v12  ;;  %v263_v12 = vsel %vm809_vm4, %v761_v59, 0.0 }
 0x16e   :  { %v212_v14 = vpop.xlane.xlu1 %211 }
 0x16f   :  { %v241_v15 = vsub.f32 %v727_v31, %v212_v14  ;;  %v208_v16 = vpop.xlane.xlu0 %207 }
 0x170   :  { %v239_v18 = vsub.f32 %v729_v34, %v208_v16 }
 0x171   :  { %v273_v19 = vsel %vm187_vm1, %v241_v15, %v257_v17 }
 0x172   :  { %v291_v21 = vmul.f32 1.442695, %v273_v19  ;;  %v271_v22 = vsel %vm187_vm1, %v239_v18, %v255_v20  ;;  %v214_v23 = vpop.xlane.xlu1 %213  ;;  %v264_v19 = vsel %vm809_vm4, %v766_v61, 0.0 }
 0x173   :  { %v287_v24 = vmul.f32 1.442695, %v271_v22  ;;  %v242_v25 = vsub.f32 %v731_v37, %v214_v23  ;;  %v210_v26 = vpop.xlane.xlu0 %209 }
 0x174   :  { %548 = vpow2.f32 %v291_v21  ;;  %v240_v29 = vsub.f32 %v736_v41, %v210_v26 }
 0x175   :  { %v274_v30 = vsel %vm187_vm1, %v242_v25, %v258_v28  ;;  %550 = vpow2.f32 %v287_v24  ;;  %v265_v28 = vsel %vm809_vm4, %v768_v62, 0.0 }
 0x176   :  { %v272_v33 = vsel %vm187_vm1, %v240_v29, %v256_v32  ;;  %v293_v35 = vmul.f32 1.442695, %v274_v30 }
 0x177   :  { %v289_v36 = vmul.f32 1.442695, %v272_v33  ;;  %v216_v38 = vpop.xlane.xlu0 %215 }
 0x178   :  { %v243_v39 = vsub.f32 %v747_v49, %v216_v38 }
 0x179   :  { %552 = vpow2.f32 %v289_v36  ;;  %v218_v40 = vpop.xlane.xlu1 %217 }
 0x17a   :  { %v244_v43 = vsub.f32 %v751_v55, %v218_v40  ;;  %554 = vpow2.f32 %v293_v35  ;;  %v275_v44 = vsel %vm187_vm1, %v243_v39, %v259_v42  ;;  %v266_v35 = vsel %vm809_vm4, %v776_v1, 0.0 }
 0x17b   :  { %v220_v46 = vpop.xlane.xlu0 %219  ;;  %v295_v56 = vmul.f32 1.442695, %v275_v44  ;;  %v267_v44 = vsel %vm809_vm4, %v781_v3, 0.0 }
 0x17c   :  { %v276_v47 = vsel %vm187_vm1, %v244_v43, %v260_v45  ;;  %v245_v48 = vsub.f32 %v749_v54, %v220_v46 }
 0x17d   :  { %v297_v50 = vmul.f32 1.442695, %v276_v47  ;;  %v222_v52 = vpop.xlane.xlu1 %221 }
 0x17e   :  { %v853_v53 = vpop.eup %548  ;;  %v277_v58 = vsel %vm187_vm1, %v245_v48, %v261_v51  ;;  %v246_v60 = vsub.f32 %v756_v57, %v222_v52  ;;  %v268_v51 = vsel %vm809_vm4, %v786_v5, 0.0 }
 0x17f   :  { %556 = vpow2.f32 %v297_v50  ;;  %v299_v63 = vmul.f32 1.442695, %v277_v58  ;;  %v224_v2 = vpop.xlane.xlu0 %223  ;;  %v864_v4 = vsel %vm187_vm1, %v853_v53, 0.0  ;;  %v866_v6 = vpop.eup %550 }
 0x180   :  { %v278_v8 = vsel %vm187_vm1, %v246_v60, %v262_v0  ;;  %v247_v10 = vsub.f32 %v761_v59, %v224_v2  ;;  %339 = vadd.xlane.f32.xlu0 %v864_v4  ;;  %v886_v21 = vsel %vm187_vm1, %v866_v6, 0.0 }
 0x181   :  { %558 = vpow2.f32 %v299_v63  ;;  %v301_v11 = vmul.f32 1.442695, %v278_v8  ;;  %v226_v14 = vpop.xlane.xlu1 %225 }
 0x182   :  { %560 = vpow2.f32 %v295_v56  ;;  %v279_v15 = vsel %vm187_vm1, %v247_v10, %v263_v12  ;;  %v248_v16 = vsub.f32 %v766_v61, %v226_v14  ;;  %v269_v10 = vsel %vm809_vm4, %v791_v7, 0.0 }
 0x183   :  { %v878_v17 = vpop.eup %552  ;;  %562 = vpow2.f32 %v301_v11  ;;  %v303_v18 = vmul.f32 1.442695, %v279_v15  ;;  %v228_v20 = vpop.xlane.xlu0 %227 }
 0x184   :  { %v280_v22 = vsel %vm187_vm1, %v248_v16, %v264_v19  ;;  %v249_v23 = vsub.f32 %v768_v62, %v228_v20  ;;  %335 = vadd.xlane.f32.xlu0 %v886_v21  ;;  %v895_v24 = vsel %vm187_vm1, %v878_v17, 0.0  ;;  %v897_v25 = vpop.eup %554  ;;  %v270_v16 = vsel %vm809_vm4, %v796_v9, 0.0 }
 0x185   :  { %v305_v26 = vmul.f32 1.442695, %v280_v22  ;;  %v230_v29 = vpop.xlane.xlu1 %229  ;;  %337 = vadd.xlane.f32.xlu1 %v895_v24  ;;  %564 = vpow2.f32 %v303_v18  ;;  %v915_v40 = vsel %vm187_vm1, %v897_v25, 0.0 }
 0x186   :  { %v281_v30 = vsel %vm187_vm1, %v249_v23, %v265_v28  ;;  %v250_v32 = vsub.f32 %v776_v1, %v230_v29 }
 0x187   :  { %566 = vpow2.f32 %v305_v26  ;;  %v307_v33 = vmul.f32 1.442695, %v281_v30  ;;  %v232_v36 = vpop.xlane.xlu0 %231 }
 0x188   :  { %v282_v38 = vsel %vm187_vm1, %v250_v32, %v266_v35  ;;  %v251_v39 = vsub.f32 %v781_v3, %v232_v36 }
 0x189   :  { %v917_v42 = vpop.eup %556  ;;  %v309_v43 = vmul.f32 1.442695, %v282_v38  ;;  %v234_v45 = vpop.xlane.xlu1 %233  ;;  %341 = vadd.xlane.f32.xlu1 %v915_v40  ;;  %568 = vpow2.f32 %v307_v33 }
 0x18a   :  { %v283_v46 = vsel %vm187_vm1, %v251_v39, %v267_v44  ;;  %v252_v47 = vsub.f32 %v786_v5, %v234_v45  ;;  %v939_v63 = vsel %vm187_vm1, %v917_v42, 0.0 }
 0x18b   :  { %v926_v48 = vpop.eup %558  ;;  %570 = vpow2.f32 %v309_v43  ;;  %v311_v50 = vmul.f32 1.442695, %v283_v46  ;;  %v236_v52 = vpop.xlane.xlu0 %235 }
 0x18c   :  { %v931_v56 = vpop.eup %560  ;;  %v284_v58 = vsel %vm187_vm1, %v252_v47, %v268_v51  ;;  %v253_v60 = vsub.f32 %v791_v7, %v236_v52  ;;  %v944_v0 = vsel %vm187_vm1, %v926_v48, 0.0 }
 0x18d   :  { %v946_v2 = vpop.eup %562  ;;  %v313_v8 = vmul.f32 1.442695, %v284_v58  ;;  %v238_v11 = vpop.xlane.xlu1 %237  ;;  %345 = vadd.xlane.f32.xlu1 %v939_v63  ;;  %347 = vadd.xlane.f32.xlu0 %v944_v0  ;;  %572 = vpow2.f32 %v311_v50  ;;  %v971_v22 = vsel %vm187_vm1, %v931_v56, 0.0 }
 0x18e   :  { %v285_v12 = vsel %vm187_vm1, %v253_v60, %v269_v10  ;;  %v254_v14 = vsub.f32 %v796_v9, %v238_v11  ;;  %v966_v20 = vsel %vm187_vm1, %v946_v2, 0.0 }
 0x18f   :  { %574 = vpow2.f32 %v313_v8  ;;  %v315_v15 = vmul.f32 1.442695, %v285_v12  ;;  %v959_v18 = vpop.eup %564  ;;  %v399_v8 = vadd.f32 1e-06, %v866_v6 }
 0x190   :  { %v286_v19 = vsel %vm187_vm1, %v254_v14, %v270_v16  ;;  %v987_v30 = vsel %vm187_vm1, %v959_v18, 0.0  ;;  %v400_v16 = vadd.f32 1e-06, %v878_v17 }
 0x191   :  { %v973_v23 = vpop.eup %566  ;;  %v317_v26 = vmul.f32 1.442695, %v286_v19  ;;  %349 = vadd.xlane.f32.xlu1 %v966_v20  ;;  %343 = vadd.xlane.f32.xlu0 %v971_v22  ;;  %576 = vpow2.f32 %v315_v15  ;;  %v415_v15 = vsel %vm809_vm4, %v399_v8, %v729_v34 }
 0x192   :  { %v982_v29 = vsel %vm187_vm1, %v973_v23, 0.0  ;;  %v416_v6 = vsel %vm809_vm4, %v400_v16, %v736_v41 }
 0x193   :  { %578 = vpow2.f32 %v317_v26  ;;  %v977_v28 = vpop.eup %568 }
 0x194   :  { %v1003_v36 = vsel %vm187_vm1, %v977_v28, 0.0 }
 0x195   :  { %v989_v32 = vpop.eup %570  ;;  %353 = vadd.xlane.f32.xlu1 %v982_v29  ;;  %351 = vadd.xlane.f32.xlu0 %v987_v30 }
 0x196   :  { %v998_v35 = vsel %vm187_vm1, %v989_v32, 0.0 }
 0x197   :  { %v993_v33 = vpop.eup %572 }
 0x198   :  { %v1019_v44 = vsel %vm187_vm1, %v993_v33, 0.0 }
 0x199   :  { %v1005_v38 = vpop.eup %574  ;;  %357 = vadd.xlane.f32.xlu1 %v998_v35  ;;  %355 = vadd.xlane.f32.xlu0 %v1003_v36 }
 0x19a   :  { %v1014_v43 = vsel %vm187_vm1, %v1005_v38, 0.0 }
 0x19b   :  { %v1009_v39 = vpop.eup %576 }
 0x19c   :  { %v1033_v47 = vsel %vm187_vm1, %v1009_v39, 0.0 }
 0x19d   :  { %v1021_v45 = vpop.eup %578  ;;  %361 = vadd.xlane.f32.xlu1 %v1014_v43  ;;  %359 = vadd.xlane.f32.xlu0 %v1019_v44 }
 0x19e   :  { %v1028_v46 = vsel %vm187_vm1, %v1021_v45, 0.0 }
 0x1a1   :  { %365 = vadd.xlane.f32.xlu1 %v1028_v46  ;;  %363 = vadd.xlane.f32.xlu0 %v1033_v47 }
 0x20d   :  { %v340_v50 = vpop.xlane.xlu0 %339 }
 0x211   :  { %v336_v51 = vpop.xlane.xlu0 %335 }
 0x212   :  { %580 = vrcp.f32 %v336_v51  ;;  %v338_v52 = vpop.xlane.xlu1 %337 }
 0x213   :  { %582 = vrcp.f32 %v338_v52 }
 0x214   :  { %584 = vrcp.f32 %v340_v50 }
 0x216   :  { %v342_v58 = vpop.xlane.xlu1 %341 }
 0x217   :  { %586 = vrcp.f32 %v342_v58  ;;  %v402_v58 = vadd.f32 1e-06, %v897_v25 }
 0x21a   :  { %v348_v60 = vpop.xlane.xlu0 %347  ;;  %v346_v19 = vpop.xlane.xlu1 %345 }
 0x21c   :  { %v581_v10 = vpop.eup %580 }
 0x21d   :  { %v583_v11 = vpop.eup %582  ;;  %v368_v12 = vmul.f32 %v581_v10, %v886_v21  ;;  %v401_v21 = vadd.f32 1e-06, %v853_v53 }
 0x21e   :  { %v344_v14 = vpop.xlane.xlu0 %343  ;;  %v370_v50 = vmul.f32 %v583_v11, %v895_v24  ;;  %v585_v51 = vpop.eup %584 }
 0x21f   :  { %v431_v26 = vsel %vm187_vm1, %v368_v12, %v415_v15  ;;  %588 = vrcp.f32 %v344_v14  ;;  %v372_v17 = vmul.f32 %v585_v51, %v864_v4  ;;  %v417_v24 = vsel %vm809_vm4, %v401_v21, %v727_v31  ;;  %v350_v8 = vpop.xlane.xlu1 %349 }
 0x220   :  { %447 = vxpose.xlu0.b32.start [1/16] (narrow) %v431_v26, 24  ;;  %590 = vrcp.f32 %v346_v19  ;;  %v432_v34 = vsel %vm187_vm1, %v370_v50, %v416_v6  ;;  %v418_v4 = vsel %vm809_vm4, %v402_v58, %v731_v37  ;;  %v404_v14 = vadd.f32 1e-06, %v917_v42 }
 0x221   :  { %v587_v52 = vpop.eup %586  ;;  %592 = vrcp.f32 %v348_v60  ;;  %v433_v41 = vsel %vm187_vm1, %v372_v17, %v417_v24  ;;  %v403_v60 = vadd.f32 1e-06, %v931_v56  ;;  %v405_v19 = vadd.f32 1e-06, %v926_v48 }
 0x222   :  { %v374_v53 = vmul.f32 %v587_v52, %v915_v40  ;;  %594 = vrcp.f32 %v350_v8  ;;  %v352_v11 = vpop.xlane.xlu0 %351  ;;  %v406_v51 = vadd.f32 1e-06, %v946_v2  ;;  %v408_v24 = vadd.f32 1e-06, %v973_v23 }
 0x223   :  { %596 = vrcp.f32 %v352_v11  ;;  %v419_v40 = vsel %vm809_vm4, %v403_v60, %v747_v49  ;;  %v354_v15 = vpop.xlane.xlu1 %353 }
 0x224   :  { %448 = vxpose.xlu0.b32.cont [2/16] (narrow) %v432_v34, 24  ;;  %v434_v31 = vsel %vm187_vm1, %v374_v53, %v418_v4  ;;  %598 = vrcp.f32 %v354_v15  ;;  %v407_v34 = vadd.f32 1e-06, %v959_v18  ;;  %v410_v4 = vadd.f32 1e-06, %v989_v32 }
 0x226   :  { %v356_v26 = vpop.xlane.xlu0 %355 }
 0x227   :  { %600 = vrcp.f32 %v356_v26  ;;  %v358_v6 = vpop.xlane.xlu1 %357 }
 0x228   :  { %449 = vxpose.xlu0.b32.cont [3/16] (narrow) %v433_v41, 24  ;;  %602 = vrcp.f32 %v358_v6  ;;  %v409_v41 = vadd.f32 1e-06, %v977_v28 }
 0x229   :  { %v589_v10 = vpop.eup %588 }
 0x22a   :  { %v376_v25 = vmul.f32 %v589_v10, %v971_v22  ;;  %v591_v12 = vpop.eup %590  ;;  %v420_v22 = vsel %vm809_vm4, %v404_v14, %v751_v55  ;;  %v360_v17 = vpop.xlane.xlu0 %359 }
 0x22b   :  { %v378_v56 = vmul.f32 %v591_v12, %v939_v63  ;;  %v593_v16 = vpop.eup %592  ;;  %v421_v63 = vsel %vm809_vm4, %v405_v19, %v749_v54  ;;  %604 = vrcp.f32 %v360_v17  ;;  %v362_v58 = vpop.xlane.xlu1 %361  ;;  %v412_v12 = vadd.f32 1e-06, %v1005_v38 }
 0x22c   :  { %450 = vxpose.xlu0.b32.cont [4/16] (narrow) %v434_v31, 24  ;;  %v435_v37 = vsel %vm187_vm1, %v376_v25, %v419_v40  ;;  %v380_v42 = vmul.f32 %v593_v16, %v944_v0  ;;  %v595_v50 = vpop.eup %594  ;;  %v422_v0 = vsel %vm809_vm4, %v406_v51, %v756_v57  ;;  %606 = vrcp.f32 %v362_v58 }
 0x22d   :  { %v436_v49 = vsel %vm187_vm1, %v378_v56, %v420_v22  ;;  %v382_v48 = vmul.f32 %v595_v50, %v966_v20  ;;  %v597_v21 = vpop.eup %596  ;;  %v423_v20 = vsel %vm809_vm4, %v407_v34, %v761_v59  ;;  %v411_v31 = vadd.f32 1e-06, %v993_v33 }
 0x22e   :  { %v437_v55 = vsel %vm187_vm1, %v380_v42, %v421_v63  ;;  %v384_v2 = vmul.f32 %v597_v21, %v987_v30  ;;  %v599_v52 = vpop.eup %598  ;;  %v424_v30 = vsel %vm809_vm4, %v408_v24, %v766_v61  ;;  %v364_v53 = vpop.xlane.xlu0 %363  ;;  %v428_v33 = vsel %vm809_vm4, %v412_v12, %v786_v5 }
 0x22f   :  { %v438_v54 = vsel %vm187_vm1, %v382_v48, %v422_v0  ;;  %v386_v18 = vmul.f32 %v599_v52, %v982_v29  ;;  %608 = vrcp.f32 %v364_v53  ;;  %v425_v29 = vsel %vm809_vm4, %v409_v41, %v768_v62  ;;  %v366_v60 = vpop.xlane.xlu1 %365 }
 0x230   :  { %451 = vxpose.xlu0.b32.cont [5/16] (narrow) %v435_v37, 24  ;;  %v439_v57 = vsel %vm187_vm1, %v384_v2, %v423_v20  ;;  %610 = vrcp.f32 %v366_v60 }
 0x231   :  { %v601_v8 = vpop.eup %600  ;;  %v440_v59 = vsel %vm187_vm1, %v386_v18, %v424_v30 }
 0x232   :  { %v388_v23 = vmul.f32 %v601_v8, %v1003_v36  ;;  %v603_v10 = vpop.eup %602  ;;  %v426_v36 = vsel %vm809_vm4, %v410_v4, %v776_v1 }
 0x233   :  { %v390_v28 = vmul.f32 %v603_v10, %v998_v35  ;;  %v427_v35 = vsel %vm809_vm4, %v411_v31, %v781_v3 }
 0x234   :  { %452 = vxpose.xlu0.b32.cont [6/16] (narrow) %v436_v49, 24  ;;  %v441_v61 = vsel %vm187_vm1, %v388_v23, %v425_v29 }
 0x235   :  { %v605_v11 = vpop.eup %604  ;;  %v442_v62 = vsel %vm187_vm1, %v390_v28, %v426_v36 }
 0x236   :  { %v392_v32 = vmul.f32 %v605_v11, %v1019_v44  ;;  %v607_v25 = vpop.eup %606  ;;  %v413_v44 = vadd.f32 1e-06, %v1009_v39 }
 0x237   :  { %v394_v1 = vmul.f32 %v607_v25, %v1014_v43  ;;  %v414_v43 = vadd.f32 1e-06, %v1021_v45 }
 0x238   :  { %453 = vxpose.xlu0.b32.cont [7/16] (narrow) %v437_v55, 24  ;;  %v443_v40 = vsel %vm187_vm1, %v392_v32, %v427_v35  ;;  %v429_v38 = vsel %vm809_vm4, %v413_v44, %v791_v7 }
 0x239   :  { %v609_v14 = vpop.eup %608  ;;  %v444_v15 = vsel %vm187_vm1, %v394_v1, %v428_v33  ;;  %v430_v39 = vsel %vm809_vm4, %v414_v43, %v796_v9 }
 0x23a   :  { %v396_v3 = vmul.f32 %v609_v14, %v1033_v47  ;;  %v611_v37 = vpop.eup %610 }
 0x23b   :  { %v398_v5 = vmul.f32 %v611_v37, %v1028_v46 }
 0x23c   :  { %454 = vxpose.xlu0.b32.cont [8/16] (narrow) %v438_v54, 24  ;;  %v445_v56 = vsel %vm187_vm1, %v396_v3, %v429_v38 }
 0x23d   :  { %v446_v47 = vsel %vm187_vm1, %v398_v5, %v430_v39 }
 0x240   :  { %455 = vxpose.xlu0.b32.cont [9/16] (narrow) %v439_v57, 24 }
 0x244   :  { %456 = vxpose.xlu0.b32.cont [10/16] (narrow) %v440_v59, 24 }
 0x248   :  { %457 = vxpose.xlu0.b32.cont [11/16] (narrow) %v441_v61, 24 }
 0x24c   :  { %458 = vxpose.xlu0.b32.cont [12/16] (narrow) %v442_v62, 24 }
 0x250   :  { %459 = vxpose.xlu0.b32.cont [13/16] (narrow) %v443_v40, 24 }
 0x254   :  { %460 = vxpose.xlu0.b32.cont [14/16] (narrow) %v444_v15, 24 }
 0x258   :  { %461 = vxpose.xlu0.b32.cont [15/16] (narrow) %v445_v56, 24 }
 0x25c   :  { %462 = vxpose.xlu0.b32.end [16/16] (narrow) %v446_v47, 24 }
 0x2a0   :  { %v463_v16 = vpop.trf.xlu0 }
 0x2a1   :  { %479 = vst [vmem:[#allocation2] sm:$0xff] %v463_v16 }
 0x2a4   :  { %v464_v22 = vpop.trf.xlu0 }
 0x2a5   :  { %480 = vst [vmem:[#allocation2 + $0x8] sm:$0xff] %v464_v22 }
 0x2a8   :  { %v465_v7 = vpop.trf.xlu0 }
 0x2a9   :  { %481 = vst [vmem:[#allocation2 + $0x10] sm:$0xff] %v465_v7 }
 0x2aa   :  { %623 = shalt.err (!%p620_p4)
}
 0x2ab   :  { %s624_s24 = scalar_lea.hbm %s1164_s3, 384 }
 0x2ac   :  { %p625_p5 = scmp.ne.s32.totalorder %s1164_s3, %s624_s24  ;;  %p628_p6 = scmp.lt.u32.totalorder %s624_s24, %s1164_s3 }
 0x2ae   :  { %p630_p7 = pnand %p628_p6, %p625_p5 }
 0x2b0   :  { %633 = shalt.err (!%p630_p7)
}
 0x2b1   :  { %s637_s29 = smov 128   ;;  %s638_s30 = smov 8  }
 0x2b2   :  { %493 = dma.vmem_to_hbm [thread:$0]  %s488_s2, 384, %s1164_s3, [#allocation3], %s637_s29, %s637_s29, %s638_s30  }
 0x2b3   :  { %634 = dma.done.wait [#allocation3], 384  }
 0x2b4   :  { %635 = vsyncadd [#allocation3], 4294966912 }
 0x2b5   :  { %497 = vsyncpa [#allocation3], 1 }

// kernel: tpu_custom_call.1
= control target key start
LH: loop header
LB: loop body
LE: loop exit
PB: predicated region body
PF: predicated region fallthrough
CT: control target
= control target key end

     0   :  { %vm63_vm0 = vcmask 261120   ;;  %s1142_s0 = inlined_call_operand.vmem [shape: f32[128,32], index: 0, kind: input, shape index: {}]   ;;  %s1143_s1 = inlined_call_operand.vmem [shape: bf16[32,128], index: 1, kind: input, shape index: {}]   ;;  %s1144_s2 = inlined_call_operand.vmem [shape: f32[1,128], index: 2, kind: input, shape index: {}]   ;;  %s1145_s3 = inlined_call_operand.hbm [shape: f32[128,128], index: 3, kind: output, shape index: {}]  }
   0x1   :  { %v527_v0 = vld [vmem:[%s1143_s1] sm:$0xff]   ;;  %v528_v1 = vld [vmem:[%s1143_s1 + $0x8] sm:$0xff]   ;;  %v18_v7 = vld [vmem:[%s1142_s0 + $0x10] sm:$0xff] }
   0x2   :  { %500 = vmatprep.subr.bf16.mxu0 %v527_v0  ;;  %520 = vmatprep.subr.bf16.mxu1 %v527_v0  ;;  %v16_v2 = vld [vmem:[%s1142_s0] sm:$0xff]  ;;  %v17_v3 = vld [vmem:[%s1142_s0 + $0x8] sm:$0xff]  ;;  %v19_v8 = vld [vmem:[%s1142_s0 + $0x18] sm:$0xff] }
   0x3   :  { %v24_v4 = vld [vmem:[%s1142_s0 + $0x40] sm:$0xff]  ;;  %501 = vmatpush3.bf16.msra.mxu0 %v527_v0  ;;  %522 = vmatpush3.bf16.msra.mxu1 %v527_v0  ;;  %v32_v5 = vpack.c.bf16 %v17_v3, %v16_v2  ;;  %v25_v6 = vld [vmem:[%s1142_s0 + $0x48] sm:$0xff]  ;;  %v26_v10 = vld [vmem:[%s1142_s0 + $0x50] sm:$0xff]  ;;  %v33_v14 = vpack.c.bf16 %v19_v8, %v18_v7 }
   0x4   :  { %502 = vmatprep.subr.bf16.mxu0 %v528_v1  ;;  %521 = vmatprep.subr.bf16.mxu1 %v528_v1  ;;  %v36_v9 = vpack.c.bf16 %v25_v6, %v24_v4  ;;  %v27_v11 = vld [vmem:[%s1142_s0 + $0x58] sm:$0xff]  ;;  %v20_v12 = vld [vmem:[%s1142_s0 + $0x20] sm:$0xff]  ;;  %v21_v13 = vld [vmem:[%s1142_s0 + $0x28] sm:$0xff] }
   0x5   :  { %504 = vmatprep.mubr.msk.bf16.mxu0 %vm63_vm0, %v32_v5  ;;  %v37_v15 = vpack.c.bf16 %v27_v11, %v26_v10  ;;  %v28_v16 = vld [vmem:[%s1142_s0 + $0x60] sm:$0xff]  ;;  %v29_v17 = vld [vmem:[%s1142_s0 + $0x68] sm:$0xff]  ;;  %v34_v18 = vpack.c.bf16 %v21_v13, %v20_v12 }
   0x6   :  { %512 = vmatprep.mubr.msk.bf16.mxu1 %vm63_vm0, %v36_v9  ;;  %v38_v19 = vpack.c.bf16 %v29_v17, %v28_v16 }
   0x7   :  { %503 = vmatpush3.bf16.msra.mxu0 %v528_v1  ;;  %523 = vmatpush3.bf16.msra.mxu1 %v528_v1 }
   0x8   :  { %8 = vsyncpa [#allocation3], 0  ;;  %v22_v20 = vld [vmem:[%s1142_s0 + $0x30] sm:$0xff]  ;;  %v23_v21 = vld [vmem:[%s1142_s0 + $0x38] sm:$0xff]  ;;  %v185_v26 = vlaneseq }
   0x9   :  { %v30_v22 = vld [vmem:[%s1142_s0 + $0x70] sm:$0xff]  ;;  %v31_v23 = vld [vmem:[%s1142_s0 + $0x78] sm:$0xff]  ;;  %v35_v24 = vpack.c.bf16 %v23_v21, %v22_v20  ;;  %v479_v28 = vld [vmem:[%s1144_s2] ss:$0 sm:$0xff]  ;;  %s617_s0 = smov [#allocation2]  }
   0xa   :  { %505 = vmatmul.mubr.msk.bf16.vlgmr.msra.gmra.mrb[0].mxu0 %vm63_vm0, %v33_v14  ;;  %513 = vmatmul.mubr.msk.bf16.vlgmr.msra.gmra.mrb[0].mxu1 %vm63_vm0, %v37_v15  ;;  %v39_v25 = vpack.c.bf16 %v31_v23, %v30_v22  ;;  %v702_v27 = vand.u32 127, %v185_v26  ;;  %s468_s2 = sshll.u32 %s617_s0, 4  ;;  %s469_s2 = int_to_ptr.vmem [resolvable:$true] %s468_s2 }
   0xb   :  { %508 = vmatprep.mubr.msk.bf16.mxu0 %vm63_vm0, %v34_v18  ;;  %516 = vmatprep.mubr.msk.bf16.mxu1 %vm63_vm0, %v38_v19  ;;  %s593_s22 = scalar_lea.vmem %s469_s2, 2048  ;;  %p598_p1 = scmp.lt.s32.totalorder %s469_s2, %s469_s2 }
   0xc   :  { %vm187_vm1 = vcmp.lt.s32.totalorder %v702_v27, 4  ;;  %vm188_vm2 = vcmp.ge.s32.totalorder %v702_v27, 4  ;;  %vm189_vm3 = vcmp.lt.s32.totalorder %v702_v27, 12  ;;  %p594_p0 = scmp.ne.s32.totalorder %s469_s2, %s593_s22  ;;  %p599_p2 = scmp.lt.s32.totalorder %s593_s22, %s593_s22 }
   0xd   :  { %vm790_vm4 = vmand %vm188_vm2, %vm189_vm3 }
   0xe   :  { %p600_p3 = por %p599_p2, %p598_p1 }
  0x10   :  { %p601_p4 = pnand %p600_p3, %p594_p0 }
  0x12   :  { %509 = vmatmul.mubr.msk.bf16.gmra.mrb[4].mxu0 %vm63_vm0, %v35_v24  ;;  %517 = vmatmul.mubr.msk.bf16.gmra.mrb[4].mxu1 %vm63_vm0, %v39_v25 }
  0xdd   :  { %v506_v29 = vpop.f32.mrb[0].mxu0  ;;  %v514_v30 = vpop.f32.mrb[0].mxu1 }
  0xde   :  { %v708_v31 = vadd.f32 %v506_v29, %v479_v28  ;;  %v710_v32 = vadd.f32 %v514_v30, %v479_v28  ;;  %v122_v33 = vpop.f32.mrb[1].mxu0  ;;  %v154_v34 = vpop.f32.mrb[1].mxu1 }
  0xdf   :  { %v507_v35 = vpop.f32.mrb[2].mxu0  ;;  %v515_v36 = vpop.f32.mrb[2].mxu1  ;;  %v712_v37 = vadd.f32 %v479_v28, %v122_v33  ;;  %v722_v43 = vadd.f32 %v479_v28, %v154_v34 }
  0xe0   :  { %v714_v38 = vadd.f32 %v507_v35, %v479_v28  ;;  %v125_v39 = vpop.f32.mrb[3].mxu0  ;;  %v157_v40 = vpop.f32.mrb[3].mxu1  ;;  %v201_v41 = vsel %vm187_vm1, %v710_v32, -inf  ;;  %v193_v42 = vsel %vm187_vm1, %v708_v31, -inf  ;;  %v724_v44 = vadd.f32 %v515_v36, %v479_v28 }
  0xe1   :  { %227 = vmax.xlane.f32.xlu0 %v201_v41  ;;  %211 = vmax.xlane.f32.xlu1 %v193_v42  ;;  %v191_v46 = vsel %vm187_vm1, %v712_v37, -inf  ;;  %v732_v53 = vadd.f32 %v479_v28, %v125_v39  ;;  %v734_v54 = vadd.f32 %v479_v28, %v157_v40  ;;  %v199_v56 = vsel %vm187_vm1, %v722_v43, -inf }
  0xe2   :  { %v194_v45 = vsel %vm187_vm1, %v714_v38, -inf  ;;  %v202_v55 = vsel %vm187_vm1, %v724_v44, -inf  ;;  %v265_v18 = vsel %vm790_vm4, %v710_v32, 0.0  ;;  %v257_v19 = vsel %vm790_vm4, %v708_v31, 0.0 }
  0xe3   :  { %v200_v61 = vsel %vm187_vm1, %v734_v54, -inf  ;;  %v192_v62 = vsel %vm187_vm1, %v732_v53, -inf  ;;  %v258_v29 = vsel %vm790_vm4, %v714_v38, 0.0  ;;  %v255_v30 = vsel %vm790_vm4, %v712_v37, 0.0 }
  0xe5   :  { %213 = vmax.xlane.f32.xlu1 %v194_v45  ;;  %207 = vmax.xlane.f32.xlu0 %v191_v46  ;;  %v510_v47 = vpop.f32.mrb[4].mxu0  ;;  %v518_v48 = vpop.f32.mrb[4].mxu1  ;;  %v266_v45 = vsel %vm790_vm4, %v724_v44, 0.0  ;;  %v263_v46 = vsel %vm790_vm4, %v722_v43, 0.0 }
  0xe6   :  { %v138_v49 = vpop.f32.mrb[5].mxu0  ;;  %v170_v50 = vpop.f32.mrb[5].mxu1  ;;  %v742_v59 = vadd.f32 %v510_v47, %v479_v28  ;;  %v778_v9 = vadd.f32 %v518_v48, %v479_v28 }
  0xe7   :  { %v511_v51 = vpop.f32.mrb[6].mxu0  ;;  %v519_v52 = vpop.f32.mrb[6].mxu1  ;;  %v758_v1 = vadd.f32 %v479_v28, %v138_v49  ;;  %v762_v3 = vadd.f32 %v479_v28, %v170_v50 }
  0xe8   :  { %v141_v57 = vpop.f32.mrb[7].mxu0  ;;  %v173_v58 = vpop.f32.mrb[7].mxu1  ;;  %v744_v60 = vadd.f32 %v511_v51, %v479_v28  ;;  %v197_v0 = vsel %vm187_vm1, %v742_v59, -inf  ;;  %v780_v10 = vadd.f32 %v519_v52, %v479_v28  ;;  %v205_v12 = vsel %vm187_vm1, %v778_v9, -inf }
  0xe9   :  { %229 = vmax.xlane.f32.xlu1 %v202_v55  ;;  %223 = vmax.xlane.f32.xlu0 %v199_v56  ;;  %v760_v2 = vadd.f32 %v479_v28, %v141_v57  ;;  %v764_v4 = vadd.f32 %v479_v28, %v173_v58  ;;  %v195_v6 = vsel %vm187_vm1, %v758_v1, -inf  ;;  %v203_v8 = vsel %vm187_vm1, %v762_v3, -inf }
  0xea   :  { %v198_v63 = vsel %vm187_vm1, %v744_v60, -inf  ;;  %v206_v11 = vsel %vm187_vm1, %v780_v10, -inf  ;;  %v264_v57 = vsel %vm790_vm4, %v734_v54, 0.0  ;;  %v256_v58 = vsel %vm790_vm4, %v732_v53, 0.0 }
  0xeb   :  { %v196_v5 = vsel %vm187_vm1, %v760_v2, -inf  ;;  %v204_v7 = vsel %vm187_vm1, %v764_v4, -inf }
  0xed   :  { %225 = vmax.xlane.f32.xlu1 %v200_v61  ;;  %209 = vmax.xlane.f32.xlu0 %v192_v62 }
  0xf1   :  { %221 = vmax.xlane.f32.xlu1 %v198_v63  ;;  %219 = vmax.xlane.f32.xlu0 %v197_v0 }
  0xf5   :  { %217 = vmax.xlane.f32.xlu1 %v196_v5  ;;  %215 = vmax.xlane.f32.xlu0 %v195_v6 }
  0xf9   :  { %233 = vmax.xlane.f32.xlu1 %v204_v7  ;;  %231 = vmax.xlane.f32.xlu0 %v203_v8 }
  0xfd   :  { %237 = vmax.xlane.f32.xlu1 %v206_v11  ;;  %235 = vmax.xlane.f32.xlu0 %v205_v12  ;;  %v262_v12 = vsel %vm790_vm4, %v744_v60, 0.0 }
 0x16e   :  { %v228_v14 = vpop.xlane.xlu0 %227  ;;  %v212_v15 = vpop.xlane.xlu1 %211 }
 0x16f   :  { %v249_v16 = vsub.f32 %v710_v32, %v228_v14  ;;  %v241_v17 = vsub.f32 %v708_v31, %v212_v15  ;;  %v261_v14 = vsel %vm790_vm4, %v742_v59, 0.0 }
 0x171   :  { %v281_v20 = vsel %vm187_vm1, %v249_v16, %v265_v18  ;;  %v273_v21 = vsel %vm187_vm1, %v241_v17, %v257_v19 }
 0x172   :  { %v291_v22 = vmul.f32 1.442695, %v273_v21  ;;  %v214_v23 = vpop.xlane.xlu1 %213  ;;  %v208_v24 = vpop.xlane.xlu0 %207  ;;  %v307_v25 = vmul.f32 1.442695, %v281_v20 }
 0x173   :  { %v242_v26 = vsub.f32 %v714_v38, %v214_v23  ;;  %v239_v28 = vsub.f32 %v712_v37, %v208_v24 }
 0x174   :  { %529 = vpow2.f32 %v291_v22 }
 0x175   :  { %v274_v33 = vsel %vm187_vm1, %v242_v26, %v258_v29  ;;  %v271_v34 = vsel %vm187_vm1, %v239_v28, %v255_v30  ;;  %531 = vpow2.f32 %v307_v25  ;;  %v260_v28 = vsel %vm790_vm4, %v760_v2, 0.0 }
 0x176   :  { %v293_v35 = vmul.f32 1.442695, %v274_v33  ;;  %v230_v36 = vpop.xlane.xlu1 %229  ;;  %v224_v39 = vpop.xlane.xlu0 %223  ;;  %v287_v40 = vmul.f32 1.442695, %v271_v34  ;;  %v259_v29 = vsel %vm790_vm4, %v758_v1, 0.0 }
 0x177   :  { %v250_v41 = vsub.f32 %v724_v44, %v230_v36  ;;  %v247_v42 = vsub.f32 %v722_v43, %v224_v39 }
 0x178   :  { %533 = vpow2.f32 %v293_v35 }
 0x179   :  { %v282_v47 = vsel %vm187_vm1, %v250_v41, %v266_v45  ;;  %v279_v48 = vsel %vm187_vm1, %v247_v42, %v263_v46  ;;  %535 = vpow2.f32 %v287_v40 }
 0x17a   :  { %v309_v49 = vmul.f32 1.442695, %v282_v47  ;;  %v226_v50 = vpop.xlane.xlu1 %225  ;;  %v210_v51 = vpop.xlane.xlu0 %209  ;;  %v303_v52 = vmul.f32 1.442695, %v279_v48  ;;  %v268_v48 = vsel %vm790_vm4, %v764_v4, 0.0 }
 0x17b   :  { %v248_v55 = vsub.f32 %v734_v54, %v226_v50  ;;  %v240_v56 = vsub.f32 %v732_v53, %v210_v51 }
 0x17c   :  { %537 = vpow2.f32 %v309_v49  ;;  %v267_v49 = vsel %vm790_vm4, %v762_v3, 0.0 }
 0x17d   :  { %v280_v61 = vsel %vm187_vm1, %v248_v55, %v264_v57  ;;  %v272_v62 = vsel %vm187_vm1, %v240_v56, %v256_v58  ;;  %539 = vpow2.f32 %v303_v52 }
 0x17e   :  { %v289_v63 = vmul.f32 1.442695, %v272_v62  ;;  %v222_v0 = vpop.xlane.xlu1 %221  ;;  %v220_v5 = vpop.xlane.xlu0 %219  ;;  %v305_v7 = vmul.f32 1.442695, %v280_v61 }
 0x17f   :  { %v842_v6 = vpop.eup %529  ;;  %v246_v8 = vsub.f32 %v744_v60, %v222_v0  ;;  %v245_v11 = vsub.f32 %v742_v59, %v220_v5  ;;  %v270_v5 = vsel %vm790_vm4, %v780_v10, 0.0 }
 0x180   :  { %v855_v15 = vsel %vm187_vm1, %v842_v6, 0.0  ;;  %v857_v16 = vpop.eup %531  ;;  %541 = vpow2.f32 %v289_v63 }
 0x181   :  { %v278_v17 = vsel %vm187_vm1, %v246_v8, %v262_v12  ;;  %v277_v18 = vsel %vm187_vm1, %v245_v11, %v261_v14  ;;  %339 = vadd.xlane.f32.xlu0 %v855_v15  ;;  %543 = vpow2.f32 %v305_v7  ;;  %v883_v30 = vsel %vm187_vm1, %v857_v16, 0.0 }
 0x182   :  { %v864_v19 = vpop.eup %533  ;;  %v301_v20 = vmul.f32 1.442695, %v278_v17  ;;  %v299_v21 = vmul.f32 1.442695, %v277_v18  ;;  %v218_v22 = vpop.xlane.xlu1 %217  ;;  %v269_v7 = vsel %vm790_vm4, %v778_v9, 0.0 }
 0x183   :  { %v216_v23 = vpop.xlane.xlu0 %215  ;;  %v244_v24 = vsub.f32 %v760_v2, %v218_v22  ;;  %v871_v26 = vsel %vm187_vm1, %v864_v19, 0.0  ;;  %v885_v33 = vpop.eup %535 }
 0x184   :  { %v243_v25 = vsub.f32 %v758_v1, %v216_v23  ;;  %341 = vadd.xlane.f32.xlu1 %v871_v26  ;;  %545 = vpow2.f32 %v299_v21  ;;  %v911_v50 = vsel %vm187_vm1, %v885_v33, 0.0 }
 0x185   :  { %v276_v34 = vsel %vm187_vm1, %v244_v24, %v260_v28  ;;  %355 = vadd.xlane.f32.xlu0 %v883_v30  ;;  %547 = vpow2.f32 %v301_v20 }
 0x186   :  { %v275_v35 = vsel %vm187_vm1, %v243_v25, %v259_v29  ;;  %v892_v36 = vpop.eup %537  ;;  %v234_v40 = vpop.xlane.xlu1 %233  ;;  %v297_v42 = vmul.f32 1.442695, %v276_v34 }
 0x187   :  { %v295_v39 = vmul.f32 1.442695, %v275_v35  ;;  %v232_v41 = vpop.xlane.xlu0 %231  ;;  %v252_v45 = vsub.f32 %v764_v4, %v234_v40  ;;  %v899_v47 = vsel %vm187_vm1, %v892_v36, 0.0  ;;  %v913_v51 = vpop.eup %539 }
 0x188   :  { %v251_v46 = vsub.f32 %v762_v3, %v232_v41  ;;  %357 = vadd.xlane.f32.xlu1 %v899_v47  ;;  %v933_v8 = vsel %vm187_vm1, %v913_v51, 0.0 }
 0x189   :  { %549 = vpow2.f32 %v295_v39  ;;  %v284_v52 = vsel %vm187_vm1, %v252_v45, %v268_v48  ;;  %335 = vadd.xlane.f32.xlu0 %v911_v50 }
 0x18a   :  { %v283_v55 = vsel %vm187_vm1, %v251_v46, %v267_v49  ;;  %v238_v57 = vpop.xlane.xlu1 %237  ;;  %v920_v61 = vpop.eup %541  ;;  %551 = vpow2.f32 %v297_v42  ;;  %v313_v62 = vmul.f32 1.442695, %v284_v52 }
 0x18b   :  { %v311_v56 = vmul.f32 1.442695, %v283_v55  ;;  %v236_v58 = vpop.xlane.xlu0 %235  ;;  %v254_v63 = vsub.f32 %v780_v10, %v238_v57  ;;  %v938_v11 = vsel %vm187_vm1, %v920_v61, 0.0  ;;  %v940_v12 = vpop.eup %543 }
 0x18c   :  { %v253_v0 = vsub.f32 %v778_v9, %v236_v58  ;;  %337 = vadd.xlane.f32.xlu1 %v938_v11  ;;  %v955_v23 = vsel %vm187_vm1, %v940_v12, 0.0 }
 0x18d   :  { %553 = vpow2.f32 %v311_v56  ;;  %v286_v14 = vsel %vm187_vm1, %v254_v63, %v270_v5  ;;  %351 = vadd.xlane.f32.xlu0 %v933_v8 }
 0x18e   :  { %v285_v17 = vsel %vm187_vm1, %v253_v0, %v269_v7  ;;  %v948_v20 = vpop.eup %545  ;;  %555 = vpow2.f32 %v313_v62  ;;  %v317_v21 = vmul.f32 1.442695, %v286_v14  ;;  %v401_v62 = vadd.f32 1e-06, %v842_v6 }
 0x18f   :  { %v315_v18 = vmul.f32 1.442695, %v285_v17  ;;  %v950_v22 = vpop.eup %547  ;;  %v960_v24 = vsel %vm187_vm1, %v948_v20, 0.0  ;;  %v402_v0 = vadd.f32 1e-06, %v864_v19 }
 0x190   :  { %353 = vadd.xlane.f32.xlu1 %v955_v23  ;;  %v969_v28 = vsel %vm187_vm1, %v950_v22, 0.0  ;;  %v409_v17 = vadd.f32 1e-06, %v857_v16 }
 0x191   :  { %557 = vpow2.f32 %v315_v18  ;;  %347 = vadd.xlane.f32.xlu0 %v960_v24  ;;  %v417_v18 = vsel %vm790_vm4, %v401_v62, %v708_v31  ;;  %v418_v16 = vsel %vm790_vm4, %v402_v0, %v714_v38 }
 0x192   :  { %559 = vpow2.f32 %v317_v21  ;;  %v425_v62 = vsel %vm790_vm4, %v409_v17, %v710_v32  ;;  %v400_v32 = vadd.f32 1e-06, %v920_v61 }
 0x193   :  { %v964_v25 = vpop.eup %549 }
 0x194   :  { %v974_v29 = vsel %vm187_vm1, %v964_v25, 0.0  ;;  %v976_v34 = vpop.eup %551  ;;  %349 = vadd.xlane.f32.xlu1 %v969_v28 }
 0x195   :  { %343 = vadd.xlane.f32.xlu0 %v974_v29  ;;  %v985_v39 = vsel %vm187_vm1, %v976_v34, 0.0 }
 0x197   :  { %v980_v35 = vpop.eup %553 }
 0x198   :  { %v990_v40 = vsel %vm187_vm1, %v980_v35, 0.0  ;;  %v992_v41 = vpop.eup %555  ;;  %345 = vadd.xlane.f32.xlu1 %v985_v39 }
 0x199   :  { %359 = vadd.xlane.f32.xlu0 %v990_v40  ;;  %v1001_v45 = vsel %vm187_vm1, %v992_v41, 0.0 }
 0x19b   :  { %v996_v42 = vpop.eup %557 }
 0x19c   :  { %v1006_v46 = vsel %vm187_vm1, %v996_v42, 0.0  ;;  %v1008_v48 = vpop.eup %559  ;;  %361 = vadd.xlane.f32.xlu1 %v1001_v45 }
 0x19d   :  { %363 = vadd.xlane.f32.xlu0 %v1006_v46  ;;  %v1015_v49 = vsel %vm187_vm1, %v1008_v48, 0.0 }
 0x1a0   :  { %365 = vadd.xlane.f32.xlu1 %v1015_v49 }
 0x20e   :  { %v340_v52 = vpop.xlane.xlu0 %339 }
 0x20f   :  { %561 = vrcp.f32 %v340_v52 }
 0x211   :  { %v342_v55 = vpop.xlane.xlu1 %341 }
 0x212   :  { %563 = vrcp.f32 %v342_v55  ;;  %v356_v56 = vpop.xlane.xlu0 %355 }
 0x213   :  { %565 = vrcp.f32 %v356_v56 }
 0x215   :  { %v358_v57 = vpop.xlane.xlu1 %357 }
 0x216   :  { %567 = vrcp.f32 %v358_v57  ;;  %v336_v58 = vpop.xlane.xlu0 %335  ;;  %v399_v57 = vadd.f32 1e-06, %v885_v33 }
 0x217   :  { %569 = vrcp.f32 %v336_v58 }
 0x219   :  { %v562_v63 = vpop.eup %561  ;;  %v338_v7 = vpop.xlane.xlu1 %337 }
 0x21a   :  { %v372_v5 = vmul.f32 %v562_v63, %v855_v15  ;;  %v352_v14 = vpop.xlane.xlu0 %351  ;;  %571 = vrcp.f32 %v338_v7  ;;  %v410_v15 = vadd.f32 1e-06, %v892_v36 }
 0x21b   :  { %573 = vrcp.f32 %v352_v14  ;;  %v415_v14 = vsel %vm790_vm4, %v399_v57, %v712_v37  ;;  %v416_v37 = vsel %vm790_vm4, %v400_v32, %v732_v53 }
 0x21c   :  { %v564_v21 = vpop.eup %563  ;;  %v433_v52 = vsel %vm187_vm1, %v372_v5, %v417_v18  ;;  %v426_v33 = vsel %vm790_vm4, %v410_v15, %v724_v44 }
 0x21d   :  { %v566_v6 = vpop.eup %565  ;;  %449 = vst [vmem:[#allocation2 + $0x10] sm:$0xff] %v433_v52  ;;  %v374_v19 = vmul.f32 %v564_v21, %v871_v26  ;;  %v354_v56 = vpop.xlane.xlu1 %353  ;;  %v408_v52 = vadd.f32 1e-06, %v940_v12 }
 0x21e   :  { %v388_v55 = vmul.f32 %v566_v6, %v883_v30  ;;  %v348_v31 = vpop.xlane.xlu0 %347  ;;  %575 = vrcp.f32 %v354_v56  ;;  %v405_v6 = vadd.f32 1e-06, %v948_v20  ;;  %v406_v20 = vadd.f32 1e-06, %v950_v22 }
 0x21f   :  { %v434_v58 = vsel %vm187_vm1, %v374_v19, %v418_v16  ;;  %577 = vrcp.f32 %v348_v31  ;;  %v424_v56 = vsel %vm790_vm4, %v408_v52, %v734_v54  ;;  %v403_v31 = vadd.f32 1e-06, %v964_v25 }
 0x220   :  { %v568_v26 = vpop.eup %567  ;;  %450 = vst [vmem:[#allocation2 + $0x18] sm:$0xff] %v434_v58  ;;  %v441_v36 = vsel %vm187_vm1, %v388_v55, %v425_v62  ;;  %v404_v25 = vadd.f32 1e-06, %v976_v34 }
 0x221   :  { %v570_v38 = vpop.eup %569  ;;  %457 = vst [vmem:[#allocation2 + $0x50] sm:$0xff] %v441_v36  ;;  %v390_v30 = vmul.f32 %v568_v26, %v899_v47  ;;  %v350_v0 = vpop.xlane.xlu1 %349  ;;  %v407_v47 = vadd.f32 1e-06, %v913_v51  ;;  %v422_v26 = vsel %vm790_vm4, %v406_v20, %v744_v60 }
 0x222   :  { %v368_v63 = vmul.f32 %v570_v38, %v911_v50  ;;  %v344_v5 = vpop.xlane.xlu0 %343  ;;  %579 = vrcp.f32 %v350_v0  ;;  %v413_v0 = vadd.f32 1e-06, %v996_v42 }
 0x223   :  { %v442_v7 = vsel %vm187_vm1, %v390_v30, %v426_v33  ;;  %581 = vrcp.f32 %v344_v5  ;;  %v419_v30 = vsel %vm790_vm4, %v403_v31, %v758_v1 }
 0x224   :  { %458 = vst [vmem:[#allocation2 + $0x58] sm:$0xff] %v442_v7  ;;  %v431_v44 = vsel %vm187_vm1, %v368_v63, %v415_v14  ;;  %v572_v50 = vpop.eup %571  ;;  %v429_v14 = vsel %vm790_vm4, %v413_v0, %v778_v9 }
 0x225   :  { %447 = vst [vmem:[#allocation2] sm:$0xff] %v431_v44  ;;  %v574_v17 = vpop.eup %573  ;;  %v370_v61 = vmul.f32 %v572_v50, %v938_v11  ;;  %v346_v18 = vpop.xlane.xlu1 %345  ;;  %v423_v11 = vsel %vm790_vm4, %v407_v47, %v722_v43 }
 0x226   :  { %v360_v21 = vpop.xlane.xlu0 %359  ;;  %v384_v51 = vmul.f32 %v574_v17, %v933_v8  ;;  %583 = vrcp.f32 %v346_v18 }
 0x227   :  { %v432_v19 = vsel %vm187_vm1, %v370_v61, %v416_v37  ;;  %585 = vrcp.f32 %v360_v21 }
 0x228   :  { %v576_v15 = vpop.eup %575  ;;  %448 = vst [vmem:[#allocation2 + $0x8] sm:$0xff] %v432_v19  ;;  %v439_v12 = vsel %vm187_vm1, %v384_v51, %v423_v11 }
 0x229   :  { %v578_v16 = vpop.eup %577  ;;  %455 = vst [vmem:[#allocation2 + $0x40] sm:$0xff] %v439_v12  ;;  %v386_v53 = vmul.f32 %v576_v15, %v955_v23  ;;  %v362_v8 = vpop.xlane.xlu1 %361  ;;  %v421_v23 = vsel %vm790_vm4, %v405_v6, %v742_v59  ;;  %v411_v59 = vadd.f32 1e-06, %v980_v35  ;;  %v420_v35 = vsel %vm790_vm4, %v404_v25, %v760_v2 }
 0x22a   :  { %v364_v55 = vpop.xlane.xlu0 %363  ;;  %v380_v43 = vmul.f32 %v578_v16, %v960_v24  ;;  %587 = vrcp.f32 %v362_v8 }
 0x22b   :  { %v440_v57 = vsel %vm187_vm1, %v386_v53, %v424_v56  ;;  %589 = vrcp.f32 %v364_v55  ;;  %v427_v5 = vsel %vm790_vm4, %v411_v59, %v762_v3 }
 0x22c   :  { %v580_v58 = vpop.eup %579  ;;  %456 = vst [vmem:[#allocation2 + $0x48] sm:$0xff] %v440_v57  ;;  %v437_v22 = vsel %vm187_vm1, %v380_v43, %v421_v23 }
 0x22d   :  { %v582_v62 = vpop.eup %581  ;;  %453 = vst [vmem:[#allocation2 + $0x30] sm:$0xff] %v437_v22  ;;  %v382_v54 = vmul.f32 %v580_v58, %v969_v28  ;;  %v366_v24 = vpop.xlane.xlu1 %365 }
 0x22e   :  { %v376_v36 = vmul.f32 %v582_v62, %v974_v29  ;;  %591 = vrcp.f32 %v366_v24  ;;  %v412_v29 = vadd.f32 1e-06, %v992_v41 }
 0x22f   :  { %v438_v38 = vsel %vm187_vm1, %v382_v54, %v422_v26 }
 0x230   :  { %v584_v28 = vpop.eup %583  ;;  %454 = vst [vmem:[#allocation2 + $0x38] sm:$0xff] %v438_v38  ;;  %v435_v34 = vsel %vm187_vm1, %v376_v36, %v419_v30  ;;  %v428_v42 = vsel %vm790_vm4, %v412_v29, %v764_v4 }
 0x231   :  { %v586_v33 = vpop.eup %585  ;;  %451 = vst [vmem:[#allocation2 + $0x20] sm:$0xff] %v435_v34  ;;  %v378_v60 = vmul.f32 %v584_v28, %v985_v39 }
 0x232   :  { %v392_v63 = vmul.f32 %v586_v33, %v990_v40  ;;  %v414_v40 = vadd.f32 1e-06, %v1008_v48 }
 0x233   :  { %v436_v1 = vsel %vm187_vm1, %v378_v60, %v420_v35 }
 0x234   :  { %v588_v32 = vpop.eup %587  ;;  %452 = vst [vmem:[#allocation2 + $0x28] sm:$0xff] %v436_v1  ;;  %v443_v39 = vsel %vm187_vm1, %v392_v63, %v427_v5  ;;  %v430_v4 = vsel %vm790_vm4, %v414_v40, %v780_v10 }
 0x235   :  { %v590_v41 = vpop.eup %589  ;;  %459 = vst [vmem:[#allocation2 + $0x60] sm:$0xff] %v443_v39  ;;  %v394_v2 = vmul.f32 %v588_v32, %v1001_v45 }
 0x236   :  { %v396_v7 = vmul.f32 %v590_v41, %v1006_v46 }
 0x237   :  { %v444_v3 = vsel %vm187_vm1, %v394_v2, %v428_v42 }
 0x238   :  { %v592_v47 = vpop.eup %591  ;;  %460 = vst [vmem:[#allocation2 + $0x68] sm:$0xff] %v444_v3  ;;  %v445_v45 = vsel %vm187_vm1, %v396_v7, %v429_v14 }
 0x239   :  { %461 = vst [vmem:[#allocation2 + $0x70] sm:$0xff] %v445_v45  ;;  %v398_v48 = vmul.f32 %v592_v47, %v1015_v49 }
 0x23b   :  { %v446_v46 = vsel %vm187_vm1, %v398_v48, %v430_v4 }
 0x23c   :  { %462 = vst [vmem:[#allocation2 + $0x78] sm:$0xff] %v446_v46 }
 0x23d   :  { %604 = shalt.err (!%p601_p4)
}
 0x23e   :  { %s605_s24 = scalar_lea.hbm %s1145_s3, 2048 }
 0x23f   :  { %p606_p5 = scmp.ne.s32.totalorder %s1145_s3, %s605_s24  ;;  %p609_p6 = scmp.lt.u32.totalorder %s605_s24, %s1145_s3 }
 0x241   :  { %p611_p7 = pnand %p609_p6, %p606_p5 }
 0x243   :  { %614 = shalt.err (!%p611_p7)
}
 0x244   :  { %s618_s29 = smov 128   ;;  %s619_s30 = smov 8  }
 0x245   :  { %474 = dma.vmem_to_hbm [thread:$0]  %s469_s2, 2048, %s1145_s3, [#allocation3], %s618_s29, %s618_s29, %s619_s30  }
 0x246   :  { %615 = dma.done.wait [#allocation3], 2048  }
 0x247   :  { %616 = vsyncadd [#allocation3], 4294965248 }
 0x248   :  { %478 = vsyncpa [#allocation3], 1 }

</bundles_post_ra>
